<compile_context>
chip_gen: v5e
topology: v5e:2x2
jax: 0.10.0
libtpu: 0.0.40
codegen_flags: <defaults>
</compile_context>

<pallas_src>
import functools

import jax
import jax.numpy as jnp
from jax import lax
from jax.experimental import pallas as pl
from jax.experimental.pallas import tpu as pltpu


def _rup(x, m):
    return -(-x // m) * m


def _sublane(dtype):
    # Native second-minor tile multiple per element width (f32:8, bf16:16, int8/fp8:32).
    it = jnp.dtype(dtype).itemsize
    return {4: 8, 2: 16, 1: 32}.get(it, 8)


def _padded_block_bytes(ks, B, F, x_dtype, w_dtype, o_dtype):
    """VMEM footprint of one grid step's blocks, including (sublane, lane) tile padding."""
    x_it = jnp.dtype(x_dtype).itemsize
    w_it = jnp.dtype(w_dtype).itemsize
    o_it = jnp.dtype(o_dtype).itemsize
    x_b = B * _rup(ks, _sublane(x_dtype)) * _rup(F, 128) * x_it          # (B, ks, F)
    w_b = ks * _rup(F, _sublane(w_dtype)) * _rup(F, 128) * w_it          # (ks, F, F)  (dominant)
    o_b = _rup(B, _sublane(o_dtype)) * _rup(ks * F, 128) * o_it          # (B, ks*F)
    return x_b + w_b + o_b


def _vmem_budget_bytes():
    """Generation-aware budget for the double-buffered blocks of one grid step."""
    try:
        cap = int(pltpu.get_tpu_info().vmem_capacity_bytes)
    except Exception:  # not queryable (e.g. interpret mode) -> assume the smallest (v7x)
        cap = 64 * 1024 * 1024
    if cap >= 120 * 1024 * 1024:          # v5e / v6e: 128 MiB physical VMEM
        return 96 * 1024 * 1024
    return 44 * 1024 * 1024               # v7x: 64 MiB physical, leave scratch headroom


def _choose_block_slots(in_dim, B, F, x_dtype, w_dtype, o_dtype, budget_bytes):
    """Pick slots-per-step ks: padding-aware VMEM fit, lane-dense output, >=2 grid steps
    when possible (v7x megacore), then largest ks."""
    sub = _sublane(x_dtype)

    def fits(ks):
        return 2 * _padded_block_bytes(ks, B, F, x_dtype, w_dtype, o_dtype) <= budget_bytes

    def valid(ks):
        # x block (B, ks, F): ks must be full or a sublane multiple for a clean tiling.
        return in_dim % ks == 0 and (ks == in_dim or ks % sub == 0) and fits(ks)

    cands = [k for k in range(1, in_dim + 1) if valid(k)]
    if not cands:
        # TODO(synk): fallback relies on Mosaic handling sub-tile sublane blocks for
        # awkward in_/budget combinations.
        cands = [k for k in range(1, in_dim + 1) if in_dim % k == 0 and fits(k)] or [1]

    def lane_dense(ks):
        return ks == in_dim or (ks * F) % 128 == 0

    # lane-dense store (full vst + dense writeback DMA)  >  keep >= 2 parallel grid steps
    # (both v7x TensorCores)  >  largest ks (fewest grid steps, longest weight DMAs).
    return max(cands, key=lambda k: (lane_dense(k), (in_dim // k) >= 2, k))


def _split_linear_block_kernel(x_ref, w_ref, o_ref, *, ks: int, f: int):
    # x_ref: (B, ks, F)    slots [i*ks, (i+1)*ks) of x (compute dtype)
    # w_ref: (ks, F, F)    matching weights, PyTorch (out_features, in_features) layout
    # o_ref: (B, ks*F)     slot results concatenated along lanes (lane-dense block)
    #
    # Each slot result is stored into its lane slice immediately: no ks-way concatenate,
    # at most one (B, F) partial result live at a time (no vreg-file pressure / spills).
    # The tiny per-slot matmuls hide under the weight-streaming DMA.
    for s in range(ks):                       # ks is a small compile-time constant
        x_s = x_ref[:, s, :]                  # (B, F)
        w_s = w_ref[s]                        # (F_out, F_in)
        # x_s @ w_s.T without an explicit transpose: contract axis 1 of both operands.
        y = lax.dot_general(
            x_s, w_s,
            dimension_numbers=(((1,), (1,)), ((), ())),
            preferred_element_type=jnp.float32,
        )                                     # (B, F_out), f32 accumulation on the MXU
        o_ref[:, s * f:(s + 1) * f] = y.astype(o_ref.dtype)


def split_linear_forward(x, weights, *, compute_dtype=jnp.bfloat16, vmem_budget_bytes=None):
    """
    x:       (B, in_, F)   -- PyTorch convention
    weights: (in_, F, F)   -- weights[i] == linear{i}.weight  (out_features, in_features)
    returns: (B, in_, F)   in x's original dtype
    """
    B, in_dim, F = x.shape
    assert weights.shape == (in_dim, F, F)
    out_dtype = x.dtype

    # Stream operands in the (cheaper) compute dtype; the kernel accumulates in f32.
    # TODO(synk): int8 weights (v5e/v6e) or fp8-e4m3 (v7x) with per-slot scales would halve
    # HBM traffic again; omitted here to preserve the module's numerics.
    if compute_dtype is not None:
        x = x.astype(compute_dtype)
        weights = weights.astype(compute_dtype)

    if vmem_budget_bytes is None:
        vmem_budget_bytes = _vmem_budget_bytes()

    ks = _choose_block_slots(in_dim, B, F, x.dtype, weights.dtype, out_dtype,
                             vmem_budget_bytes)
    n_blocks = in_dim // ks

    per_step = _padded_block_bytes(ks, B, F, x.dtype, weights.dtype, out_dtype)
    vmem_limit = int(min(vmem_budget_bytes + 8 * 1024 * 1024,
                         max(32 * 1024 * 1024, 2 * per_step + 8 * 1024 * 1024)))

    flops = 2 * B * in_dim * F * F
    bytes_accessed = int(x.size * jnp.dtype(x.dtype).itemsize
                         + weights.size * jnp.dtype(weights.dtype).itemsize
                         + B * in_dim * F * jnp.dtype(out_dtype).itemsize)

    out2d = pl.pallas_call(
        functools.partial(_split_linear_block_kernel, ks=ks, f=F),
        out_shape=jax.ShapeDtypeStruct((B, in_dim * F), out_dtype),
        grid_spec=pltpu.PrefetchScalarGridSpec(
            num_scalar_prefetch=0,
            grid=(n_blocks,),
            in_specs=[
                pl.BlockSpec((B, ks, F), lambda i: (0, i, 0)),    # x slots [i*ks, (i+1)*ks)
                pl.BlockSpec((ks, F, F), lambda i: (i, 0, 0)),    # matching weights
            ],
            # Lane-dense output block; the final (B, in_, F) is a free contiguous reshape.
            out_specs=pl.BlockSpec((B, ks * F), lambda i: (0, i)),
        ),
        compiler_params=pltpu.CompilerParams(
            dimension_semantics=("parallel",),   # slot-blocks are independent (megacore)
            vmem_limit_bytes=vmem_limit,
        ),
        cost_estimate=pl.CostEstimate(flops=flops, transcendentals=0,
                                      bytes_accessed=bytes_accessed),
    )(x, weights)

    return out2d.reshape(B, in_dim, F)


if __name__ == "__main__":
    # Small shapes consistent with the module: batch=2, in_=4 slots, feature=32.
    B, IN_DIM, FEATURE = 2, 4, 32

    key = jax.random.PRNGKey(0)
    kx, kw = jax.random.split(key)

    x = jax.random.normal(kx, (B, IN_DIM, FEATURE), dtype=jnp.float32)
    # nn.Linear default init: U(-1/sqrt(F), 1/sqrt(F)), bias=False.
    bound = 1.0 / (FEATURE ** 0.5)
    weights = jax.random.uniform(
        kw, (IN_DIM, FEATURE, FEATURE), dtype=jnp.float32, minval=-bound, maxval=bound
    )

    out = split_linear_forward(x, weights)           # default: bf16 streaming, f32 accumulate
    out = jax.block_until_ready(out)

    # Pure-JAX reference using the same bf16-rounded operands and f32 accumulation:
    #   out[b, i, g] = sum_f x[b, i, f] * W[i, g, f]
    x_r = x.astype(jnp.bfloat16).astype(jnp.float32)
    w_r = weights.astype(jnp.bfloat16).astype(jnp.float32)
    ref = jnp.einsum("bif,igf->big", x_r, w_r, precision=lax.Precision.HIGHEST)

    assert out.shape == (B, IN_DIM, FEATURE)
    assert out.dtype == x.dtype
    assert jnp.allclose(out.astype(jnp.float32), ref, atol=2e-2, rtol=2e-2)

    print("KERNEL_OK")
</pallas_src>

<mosaic_0001>
module attributes {stable_mosaic.version = 11 : i64} {
  func.func @_split_linear_block_kernel(%arg0: i32, %arg1: memref<2x4x32xbf16, #tpu.memory_space<vmem>>, %arg2: memref<4x32x32xbf16, #tpu.memory_space<vmem>>, %arg3: memref<2x128xf32, #tpu.memory_space<vmem>>) attributes {dimension_semantics = [#tpu.dimension_semantics<parallel>], iteration_bounds = array<i64: 1>, scalar_prefetch = 0 : i64, scratch_operands = 0 : i64, tpu.core_type = #tpu.core_type<tc>, window_params = [{transform_indices = @transform_0, window_bounds = array<i64: 2, 4, 32>}, {transform_indices = @transform_1, window_bounds = array<i64: 4, 32, 32>}, {transform_indices = @transform_2, window_bounds = array<i64: 2, 128>}]} {
    %c0 = arith.constant 0 : index
    %c0_0 = arith.constant 0 : index
    %c0_1 = arith.constant 0 : index
    %0 = vector.load %arg1[%c0, %c0_0, %c0_1] : memref<2x4x32xbf16, #tpu.memory_space<vmem>>, vector<2x1x32xbf16>
    %1 = vector.shape_cast %0 : vector<2x1x32xbf16> to vector<2x32xbf16>
    %c0_2 = arith.constant 0 : index
    %c0_3 = arith.constant 0 : index
    %c0_4 = arith.constant 0 : index
    %2 = vector.load %arg2[%c0_2, %c0_3, %c0_4] : memref<4x32x32xbf16, #tpu.memory_space<vmem>>, vector<1x32x32xbf16>
    %3 = vector.shape_cast %2 : vector<1x32x32xbf16> to vector<32x32xbf16>
    %cst = arith.constant dense<0.000000e+00> : vector<2x32xf32>
    %4 = tpu.matmul %1, %3, %cst {dimension_numbers = #tpu.dot_dimension_numbers<[1], [1], [0], [0], [0, 0, 1, 0], [], []>} : vector<2x32xbf16>, vector<32x32xbf16>, vector<2x32xf32> -> vector<2x32xf32>
    %c0_5 = arith.constant 0 : index
    %c0_6 = arith.constant 0 : index
    %5 = vector.load %arg3[%c0_5, %c0_6] : memref<2x128xf32, #tpu.memory_space<vmem>>, vector<2x32xf32>
    tpu.vector_store %arg3[%c0_5, %c0_6], %4 {strides = array<i32>} : memref<2x128xf32, #tpu.memory_space<vmem>>, vector<2x32xf32>,
    %c0_7 = arith.constant 0 : index
    %c1 = arith.constant 1 : index
    %c0_8 = arith.constant 0 : index
    %6 = vector.load %arg1[%c0_7, %c1, %c0_8] : memref<2x4x32xbf16, #tpu.memory_space<vmem>>, vector<2x1x32xbf16>
    %7 = vector.shape_cast %6 : vector<2x1x32xbf16> to vector<2x32xbf16>
    %c1_9 = arith.constant 1 : index
    %c0_10 = arith.constant 0 : index
    %c0_11 = arith.constant 0 : index
    %8 = vector.load %arg2[%c1_9, %c0_10, %c0_11] : memref<4x32x32xbf16, #tpu.memory_space<vmem>>, vector<1x32x32xbf16>
    %9 = vector.shape_cast %8 : vector<1x32x32xbf16> to vector<32x32xbf16>
    %cst_12 = arith.constant dense<0.000000e+00> : vector<2x32xf32>
    %10 = tpu.matmul %7, %9, %cst_12 {dimension_numbers = #tpu.dot_dimension_numbers<[1], [1], [0], [0], [0, 0, 1, 0], [], []>} : vector<2x32xbf16>, vector<32x32xbf16>, vector<2x32xf32> -> vector<2x32xf32>
    %c0_13 = arith.constant 0 : index
    %c32 = arith.constant 32 : index
    %11 = vector.load %arg3[%c0_13, %c32] : memref<2x128xf32, #tpu.memory_space<vmem>>, vector<2x32xf32>
    tpu.vector_store %arg3[%c0_13, %c32], %10 {strides = array<i32>} : memref<2x128xf32, #tpu.memory_space<vmem>>, vector<2x32xf32>,
    %c0_14 = arith.constant 0 : index
    %c2 = arith.constant 2 : index
    %c0_15 = arith.constant 0 : index
    %12 = vector.load %arg1[%c0_14, %c2, %c0_15] : memref<2x4x32xbf16, #tpu.memory_space<vmem>>, vector<2x1x32xbf16>
    %13 = vector.shape_cast %12 : vector<2x1x32xbf16> to vector<2x32xbf16>
    %c2_16 = arith.constant 2 : index
    %c0_17 = arith.constant 0 : index
    %c0_18 = arith.constant 0 : index
    %14 = vector.load %arg2[%c2_16, %c0_17, %c0_18] : memref<4x32x32xbf16, #tpu.memory_space<vmem>>, vector<1x32x32xbf16>
    %15 = vector.shape_cast %14 : vector<1x32x32xbf16> to vector<32x32xbf16>
    %cst_19 = arith.constant dense<0.000000e+00> : vector<2x32xf32>
    %16 = tpu.matmul %13, %15, %cst_19 {dimension_numbers = #tpu.dot_dimension_numbers<[1], [1], [0], [0], [0, 0, 1, 0], [], []>} : vector<2x32xbf16>, vector<32x32xbf16>, vector<2x32xf32> -> vector<2x32xf32>
    %c0_20 = arith.constant 0 : index
    %c64 = arith.constant 64 : index
    %17 = vector.load %arg3[%c0_20, %c64] : memref<2x128xf32, #tpu.memory_space<vmem>>, vector<2x32xf32>
    tpu.vector_store %arg3[%c0_20, %c64], %16 {strides = array<i32>} : memref<2x128xf32, #tpu.memory_space<vmem>>, vector<2x32xf32>,
    %c0_21 = arith.constant 0 : index
    %c3 = arith.constant 3 : index
    %c0_22 = arith.constant 0 : index
    %18 = vector.load %arg1[%c0_21, %c3, %c0_22] : memref<2x4x32xbf16, #tpu.memory_space<vmem>>, vector<2x1x32xbf16>
    %19 = vector.shape_cast %18 : vector<2x1x32xbf16> to vector<2x32xbf16>
    %c3_23 = arith.constant 3 : index
    %c0_24 = arith.constant 0 : index
    %c0_25 = arith.constant 0 : index
    %20 = vector.load %arg2[%c3_23, %c0_24, %c0_25] : memref<4x32x32xbf16, #tpu.memory_space<vmem>>, vector<1x32x32xbf16>
    %21 = vector.shape_cast %20 : vector<1x32x32xbf16> to vector<32x32xbf16>
    %cst_26 = arith.constant dense<0.000000e+00> : vector<2x32xf32>
    %22 = tpu.matmul %19, %21, %cst_26 {dimension_numbers = #tpu.dot_dimension_numbers<[1], [1], [0], [0], [0, 0, 1, 0], [], []>} : vector<2x32xbf16>, vector<32x32xbf16>, vector<2x32xf32> -> vector<2x32xf32>
    %c0_27 = arith.constant 0 : index
    %c96 = arith.constant 96 : index
    %23 = vector.load %arg3[%c0_27, %c96] : memref<2x128xf32, #tpu.memory_space<vmem>>, vector<2x32xf32>
    tpu.vector_store %arg3[%c0_27, %c96], %22 {strides = array<i32>} : memref<2x128xf32, #tpu.memory_space<vmem>>, vector<2x32xf32>,
    return
  }
  func.func @transform_0(%arg0: i32) -> (i32, i32, i32) {
    %c0_i32 = arith.constant 0 : i32
    %c0_i32_0 = arith.constant 0 : i32
    %c0_i32_1 = arith.constant 0 : i32
    return %c0_i32, %arg0, %c0_i32_0 : i32, i32, i32
  }
  func.func @transform_1(%arg0: i32) -> (i32, i32, i32) {
    %c0_i32 = arith.constant 0 : i32
    %c0_i32_0 = arith.constant 0 : i32
    %c0_i32_1 = arith.constant 0 : i32
    return %arg0, %c0_i32, %c0_i32_0 : i32, i32, i32
  }
  func.func @transform_2(%arg0: i32) -> (i32, i32) {
    %c0_i32 = arith.constant 0 : i32
    %c0_i32_0 = arith.constant 0 : i32
    return %c0_i32, %arg0 : i32, i32
  }
}

</mosaic_0001>

<bundles_post_ra>
// kernel: tpu_custom_call.1
= control target key start
LH: loop header
LB: loop body
LE: loop exit
PB: predicated region body
PF: predicated region fallthrough
CT: control target
= control target key end

     0   :  { %7 = vsyncpa [#allocation3], 0  ;;  %s482_s0 = inlined_call_operand.hbm [shape: bf16[2,4,32], index: 0, kind: input, shape index: {}]   ;;  %s483_s1 = inlined_call_operand.hbm [shape: bf16[4,32,32], index: 1, kind: input, shape index: {}]   ;;  %s484_s2 = inlined_call_operand.hbm [shape: f32[2,128], index: 2, kind: output, shape index: {}]  }
   0x1   :  { %8 = vsyncpa [#allocation6], 0 }
   0x2   :  { %9 = vsyncpa [#allocation4], 0  ;;  %s14_s11 = sshll.u32 %s482_s0, 4  ;;  %s428_s12 = smov [#allocation2]   ;;  %s15_s11 = int_to_ptr.hbm [resolvable:$true] %s14_s11 }
   0x3   :  { %s16_s13 = sshll.u32 %s428_s12, 4  ;;  %s27_s16 = sshll.u32 %s483_s1, 4  ;;  %s17_s13 = int_to_ptr.vmem [resolvable:$true] %s16_s13  ;;  %s28_s16 = int_to_ptr.hbm [resolvable:$true] %s27_s16 }
   0x4   :  { %s429_s17 = smov 32   ;;  %s430_s18 = smov 2  }
   0x5   :  { %22 = dma.hbm_to_vmem [thread:$0]  %s15_s11, 64, %s17_s13, [#allocation3], %s429_s17, %s429_s17, %s430_s18  }
   0x6   :  { %s431_s19 = smov [#allocation5]   ;;  %s432_s21 = smov 64  }
   0x7   :  { %s29_s20 = sshll.u32 %s431_s19, 4  ;;  %s433_s22 = smov 4   ;;  %s30_s20 = int_to_ptr.vmem [resolvable:$true] %s29_s20 }
   0x8   :  { %35 = dma.hbm_to_vmem [thread:$0]  %s28_s16, 1024, %s30_s20, [#allocation6], %s432_s21, %s432_s21, %s433_s22  }
   0x9   :  { %422 = dma.done.wait [#allocation3], 64  }
   0xa   :  { %423 = vsyncadd [#allocation3], 4294967232 }
   0xb   :  { %424 = dma.done.wait [#allocation6], 1024  }
   0xc   :  { %425 = vsyncadd [#allocation6], 4294966272  ;;  %vm76_vm0 = vcmask 261120   ;;  %v337_v0 = vld [vmem:[#allocation5 + $0x18] sm:$0xff]  ;;  %v339_v1 = vld [vmem:[#allocation5 + $0x28] sm:$0xff]  ;;  %vm63_vm1 = vcmask 1041409  }
   0xd   :  { %v341_v2 = vld [vmem:[#allocation5 + $0x38] sm:$0xff]  ;;  %v139_v4 = vsel %vm76_vm0, %v337_v0, 0  ;;  %v199_v5 = vsel %vm76_vm0, %v339_v1, 0  ;;  %v336_v8 = vld [vmem:[#allocation5 + $0x10] sm:$0xff]  ;;  %v338_v9 = vld [vmem:[#allocation5 + $0x20] sm:$0xff]  ;;  %vm99_vm2 = vcmask 254976  }
   0xe   :  { %v45_v3 = vld [vmem:[#allocation2] sm:$0x1]  ;;  %v46_v6 = vld [vmem:[#allocation2 + $0x2] sm:$0x1]  ;;  %147 = vmatpush.bf16.xpose.msra.mxu1 %v139_v4  ;;  %207 = vmatpush.bf16.xpose.msra.mxu2 %v199_v5  ;;  %v259_v7 = vsel %vm76_vm0, %v341_v2, 0  ;;  %v340_v10 = vld [vmem:[#allocation5 + $0x30] sm:$0xff] }
   0xf   :  { %52 = vst [vmem:[#allocation1] ss:$4 sm:$0xff] %v45_v3  ;;  %267 = vmatpush.bf16.xpose.msra.mxu3 %v259_v7  ;;  %v136_v11 = vsel %vm76_vm0, %v336_v8, 0  ;;  %v196_v12 = vsel %vm76_vm0, %v338_v9, 0  ;;  %v101_v13 = vld [vmem:[#allocation2] sm:$0x1] }
  0x10   :  { %57 = vst [vmem:[#allocation1 + $0x20] ss:$4 sm:$0xff] %v46_v6  ;;  %v102_v14 = vld [vmem:[#allocation2 + $0x2] sm:$0x1]  ;;  %v256_v15 = vsel %vm76_vm0, %v340_v10, 0  ;;  %v335_v18 = vld [vmem:[#allocation5 + $0x8] sm:$0xff] }
  0x11   :  { %v84_v19 = vsel %vm76_vm0, %v335_v18, 0  ;;  %v334_v21 = vld [vmem:[#allocation5] sm:$0xff]  ;;  %v160_v22 = vld [vmem:[#allocation2] sm:$0x2]  ;;  %v161_v23 = vld [vmem:[#allocation2 + $0x2] sm:$0x2] }
  0x12   :  { %92 = vmatpush.bf16.xpose.msra.mxu0 %v84_v19  ;;  %v81_v29 = vsel %vm76_vm0, %v334_v21, 0  ;;  %v220_v35 = vld [vmem:[#allocation2] sm:$0x2]  ;;  %v221_v36 = vld [vmem:[#allocation2 + $0x2] sm:$0x2]  ;;  %s434_s0 = smov 96  }
  0x13   :  { %vm158_vm3 = vcmask 517376   ;;  %vm218_vm4 = vcmask 779776   ;;  %s435_s1 = smov [#allocation7]   ;;  %s287_s26 = sshll.u32 %s484_s2, 4  ;;  %vm278_vm5 = vcmask 1042176   ;;  %s288_s26 = int_to_ptr.hbm [resolvable:$true] %s287_s26 }
  0x14   :  { %s285_s23 = sshll.u32 %s435_s1, 4  ;;  %s286_s23 = int_to_ptr.vmem [resolvable:$true] %s285_s23 }
  0x16   :  { %v53_v16 = vld.sshfl [vmem:[#allocation1] sm:$0xff pattern:$0x73625140]  ;;  %148 = vmatpush.bf16.xpose.msra.mxu1 %v136_v11  ;;  %208 = vmatpush.bf16.xpose.msra.mxu2 %v196_v12 }
  0x17   :  { %v58_v17 = vld.sshfl [vmem:[#allocation1 + $0x20] sm:$0xff pattern:$0x73625140]  ;;  %109 = vst [vmem:[#allocation1] ss:$4 sm:$0xff] %v101_v13  ;;  %268 = vmatpush.bf16.xpose.msra.mxu3 %v256_v15  ;;  %v60_v25 = vunpack.c.l.b16 %v53_v16 }
  0x18   :  { %114 = vst [vmem:[#allocation1 + $0x20] ss:$4 sm:$0xff] %v102_v14  ;;  %v61_v20 = vunpack.c.l.b16 %v58_v17 }
  0x1a   :  { %v62_v26 = vrot.slane %v61_v20, 7  ;;  %93 = vmatpush.bf16.xpose.msra.mxu0 %v81_v29 }
  0x1c   :  { %v64_v32 = vsel %vm63_vm1, %v62_v26, %v60_v25 }
  0x1d   :  { %v65_v37 = vpack.c.b16 %v64_v32, %v64_v32 }
  0x1e   :  { %v110_v24 = vld.sshfl [vmem:[#allocation1] sm:$0xff pattern:$0x73625140] }
  0x1f   :  { %v115_v27 = vld.sshfl [vmem:[#allocation1 + $0x20] sm:$0xff pattern:$0x73625140]  ;;  %v117_v28 = vunpack.c.l.b16 %v110_v24  ;;  %168 = vst [vmem:[#allocation1] ss:$4 sm:$0xff] %v160_v22 }
  0x20   :  { %v118_v30 = vunpack.c.l.b16 %v115_v27  ;;  %173 = vst [vmem:[#allocation1 + $0x20] ss:$4 sm:$0xff] %v161_v23 }
  0x21   :  { %v119_v31 = vrot.slane %v117_v28, 1  ;;  %306 = vmatmul.msk.bf16.vlgmr.msra.gmra.mxu0 %vm76_vm0, %v65_v37 }
  0x23   :  { %v120_v33 = vsel %vm63_vm1, %v118_v30, %v119_v31 }
  0x24   :  { %v121_v34 = vpack.c.b16 %v120_v33, %v120_v33 }
  0x26   :  { %315 = vmatmul.msk.bf16.vlgmr.msra.gmra.mxu1 %vm76_vm0, %v121_v34  ;;  %v169_v38 = vld.sshfl [vmem:[#allocation1] sm:$0xff pattern:$0x73625140] }
  0x27   :  { %v174_v39 = vld.sshfl [vmem:[#allocation1 + $0x20] sm:$0xff pattern:$0x73625140]  ;;  %v176_v40 = vunpack.c.l.b16 %v169_v38  ;;  %228 = vst [vmem:[#allocation1] ss:$4 sm:$0xff] %v220_v35 }
  0x28   :  { %v177_v41 = vunpack.c.l.b16 %v174_v39  ;;  %233 = vst [vmem:[#allocation1 + $0x20] ss:$4 sm:$0xff] %v221_v36 }
  0x29   :  { %v178_v42 = vrot.slane %v176_v40, 2 }
  0x2a   :  { %v179_v43 = vrot.slane %v177_v41, 1 }
  0x2c   :  { %v180_v44 = vsel %vm63_vm1, %v179_v43, %v178_v42 }
  0x2d   :  { %v181_v45 = vpack.c.b16 %v180_v44, %v180_v44 }
  0x2e   :  { %v229_v46 = vld.sshfl [vmem:[#allocation1] sm:$0xff pattern:$0x73625140] }
  0x2f   :  { %324 = vmatmul.msk.bf16.vlgmr.msra.gmra.mxu2 %vm76_vm0, %v181_v45  ;;  %v234_v47 = vld.sshfl [vmem:[#allocation1 + $0x20] sm:$0xff pattern:$0x73625140]  ;;  %v236_v48 = vunpack.c.l.b16 %v229_v46 }
  0x30   :  { %v237_v49 = vunpack.c.l.b16 %v234_v47 }
  0x31   :  { %v238_v50 = vrot.slane %v236_v48, 3 }
  0x32   :  { %v239_v51 = vrot.slane %v237_v49, 2 }
  0x34   :  { %v240_v52 = vsel %vm63_vm1, %v239_v51, %v238_v50 }
  0x35   :  { %v241_v53 = vpack.c.b16 %v240_v52, %v240_v52 }
  0x37   :  { %333 = vmatmul.msk.bf16.vlgmr.msra.gmra.mxu3 %vm76_vm0, %v241_v53 }
  0x9e   :  { %v95_v55 = vpop.f32.mrf.mxu0 }
  0x9f   :  { %100 = vst.msk [vmem:[#allocation7] sm:$0x3] %vm99_vm2, %v95_v55 }
  0xa3   :  { %v150_v54 = vpop.f32.mrf.mxu1 }
  0xa4   :  { %155 = vrot.lane.b32.xlu0 %v150_v54, %s429_s17 }
  0xa6   :  { %v97_v57 = vpop.f32.mrf.mxu0 }
  0xab   :  { %v152_v56 = vpop.f32.mrf.mxu1 }
  0xb2   :  { %v210_v58 = vpop.f32.mrf.mxu2 }
  0xb3   :  { %215 = vrot.lane.b32.xlu0 %v210_v58, %s432_s21 }
  0xba   :  { %v212_v59 = vpop.f32.mrf.mxu2  ;;  %v270_v60 = vpop.f32.mrf.mxu3 }
  0xbb   :  { %275 = vrot.lane.b32.xlu1 %v270_v60, %s434_s0 }
  0xc2   :  { %v272_v61 = vpop.f32.mrf.mxu3 }
 0x116   :  { %v156_v62 = vpop.permute.xlu0 %155 }
 0x117   :  { %159 = vst.msk [vmem:[#allocation7] sm:$0x3] %vm158_vm3, %v156_v62 }
 0x125   :  { %v216_v63 = vpop.permute.xlu0 %215 }
 0x126   :  { %219 = vst.msk [vmem:[#allocation7] sm:$0x3] %vm218_vm4, %v216_v63 }
 0x12d   :  { %v276_v0 = vpop.permute.xlu1 %275 }
 0x12e   :  { %279 = vst.msk [vmem:[#allocation7] sm:$0x3] %vm278_vm5, %v276_v0 }
 0x12f   :  { %290 = dma.vmem_to_hbm [thread:$0]  %s286_s23, 32, %s288_s26, [#allocation4]  }
 0x130   :  { %426 = dma.done.wait [#allocation4], 32  }
 0x131   :  { %427 = vsyncadd [#allocation4], 4294967264 }
 0x132   :  { %295 = vsyncpa [#allocation3], 1 }
 0x133   :  { %296 = vsyncpa [#allocation6], 1 }
 0x134   :  { %297 = vsyncpa [#allocation4], 1 }

</bundles_post_ra>
